<compile_context>
chip_gen: v5e
topology: v5e:2x2
jax: 0.10.0
libtpu: 0.0.40
codegen_flags: <defaults>
</compile_context>

<pallas_src>
import functools

import jax
import jax.numpy as jnp
from jax import lax
from jax.experimental import pallas as pl
from jax.experimental.pallas import tpu as pltpu


def _upsample_rows_kernel(x_ref, o_ref, *, scale):
    """x_ref: (Rt, W) -> o_ref: (Rt, s*s*W); out[r, rh*W*s + j] = x[r, j // s]."""
    s = scale
    _, w = x_ref.shape
    ncols = o_ref.shape[-1]          # s * s * w
    wo = w * s
    dt = x_ref.dtype

    # 0/1 nearest-neighbor selection matrix built from 2-D iotas using only
    # mul/add/compare (no integer div/mod) for safe lowering:
    #   R2[k, c] = 1  iff  (c mod wo) // s == k
    col = lax.broadcasted_iota(jnp.int32, (w, ncols), 1)
    lo = lax.broadcasted_iota(jnp.int32, (w, ncols), 0) * s
    mask = None
    for r in range(s):               # s is a small static Python int
        base = r * wo
        m = (col >= lo + base) & (col < lo + base + s)
        mask = m if mask is None else (mask | m)
    r2 = jnp.where(mask, 1.0, 0.0).astype(dt)

    # Single tall-skinny matmul over the whole row block; exact for floats
    # (exactly one nonzero 1.0 term per output element).  The kernel is
    # store-bandwidth bound, so the MXU work here is slack.
    y = jnp.dot(x_ref[...], r2, preferred_element_type=jnp.float32)
    o_ref[...] = y.astype(o_ref.dtype)


def _round_up(v, m):
    return -(-v // m) * m


def _vmem_limit_bytes():
    """Scoped-VMEM limit derived from the chip's physical VMEM capacity."""
    try:
        cap = pltpu.get_tpu_info().vmem_capacity_bytes
    except Exception:
        cap = 64 * 1024 * 1024       # conservative fallback: v7x per-TC VMEM
    # ~48 MiB on v7x (64 MiB/TC), ~96 MiB on v5e/v6e (128 MiB).
    return int(min(3 * cap // 4, 96 * 1024 * 1024))


def _pick_row_block(nh, w, s, itemsize, vmem_limit):
    """Row-block size targeting ~4 MiB of output per grid step, with full
    VMEM accounting (double-buffered in/out tiles, f32 temporaries, R2)."""
    out_row = s * s * w * itemsize              # one output row
    in_row = w * itemsize                       # one input row
    f32_row = s * s * w * 4                     # f32 matmul result before cast
    per_row = 2 * (in_row + out_row) + f32_row  # 2x = double buffering
    fixed = w * s * s * w * itemsize + (256 << 10)   # R2 + slack
    budget = vmem_limit // 2                    # headroom for compiler temps
    rt_cap = max(8, (budget - fixed) // per_row)
    rt_target = max(8, (4 << 20) // out_row)    # ~4 MiB of output per step
    rt = int(min(rt_cap, rt_target))
    rt = max(8, (rt // 8) * 8)                  # sublane-aligned row block
    rt = min(rt, _round_up(nh, 8))              # don't exceed (padded) problem
    return rt


def upsampling1d(x, scale_factor):
    """Equivalent of Upsampling1D(scale_factor)(x) for x of shape (N, H, W)."""
    s = int(scale_factor)
    n, h, w = x.shape
    ho, wo = h * s, w * s

    if not jnp.issubdtype(x.dtype, jnp.floating):
        # TODO(synk): integer/bool dtypes would need a copy-based replication
        # path; the selection-matmul path is float-only.
        raise NotImplementedError("upsampling1d kernel supports float dtypes only")

    itemsize = jnp.dtype(x.dtype).itemsize
    nh = n * h
    ncols = s * s * w
    vmem_limit = _vmem_limit_bytes()
    # TODO(synk): for extremely large W (R2 ~ W^2*s^2 elements) additionally
    # tile the lane dimension; not needed for practical sizes.
    rt = _pick_row_block(nh, w, s, itemsize, vmem_limit)

    num_blocks = -(-nh // rt)                   # cdiv; rows padded if needed
    nh_pad = num_blocks * rt

    x2 = x.reshape(nh, w)                       # free: same contiguous layout
    if nh_pad != nh:
        x2 = jnp.pad(x2, ((0, nh_pad - nh), (0, 0)))

    kernel = functools.partial(_upsample_rows_kernel, scale=s)
    out2 = pl.pallas_call(
        kernel,
        out_shape=jax.ShapeDtypeStruct((nh_pad, ncols), x.dtype),
        grid_spec=pltpu.PrefetchScalarGridSpec(
            num_scalar_prefetch=0,
            grid=(num_blocks,),
            in_specs=[pl.BlockSpec((rt, w), lambda i: (i, 0))],
            out_specs=pl.BlockSpec((rt, ncols), lambda i: (i, 0)),
        ),
        compiler_params=pltpu.CompilerParams(
            dimension_semantics=("parallel",),
            vmem_limit_bytes=vmem_limit,
        ),
    )(x2)

    if nh_pad != nh:
        out2 = out2[:nh]
    # Free reshape: (N*H, s*s*W) row-major == (N, 1, H*s, W*s) row-major.
    # (This is the torch.unsqueeze(x, 1) channel dim plus the 2-D upsample.)
    return out2.reshape(n, 1, ho, wo)


if __name__ == "__main__":
    key = jax.random.PRNGKey(0)
    n, h, w, scale = 2, 16, 16, 2
    x = jax.random.normal(key, (n, h, w), dtype=jnp.float32)

    y = upsampling1d(x, scale)
    jax.block_until_ready(y)

    # Pure-JAX reference of UpsamplingNearest2d(scale)(x.unsqueeze(1)).
    ref = jnp.repeat(jnp.repeat(x, scale, axis=1), scale, axis=2)[:, None, :, :]
    assert y.shape == (n, 1, h * scale, w * scale), y.shape
    assert y.dtype == x.dtype
    assert jnp.allclose(y, ref), "mismatch vs nearest-neighbor reference"

    print("KERNEL_OK")
</pallas_src>

<mosaic_0001>
module attributes {stable_mosaic.version = 11 : i64} {
  func.func @_upsample_rows_kernel(%arg0: i32, %arg1: memref<32x16xf32, #tpu.memory_space<vmem>>, %arg2: memref<32x64xf32, #tpu.memory_space<vmem>>) attributes {dimension_semantics = [#tpu.dimension_semantics<parallel>], iteration_bounds = array<i64: 1>, scalar_prefetch = 0 : i64, scratch_operands = 0 : i64, tpu.core_type = #tpu.core_type<tc>, window_params = [{transform_indices = @transform_0, window_bounds = array<i64: 32, 16>}, {transform_indices = @transform_1, window_bounds = array<i64: 32, 64>}]} {
    %0 = tpu.iota {dimensions = array<i32: 1>} : vector<16x64xi32>
    %1 = tpu.iota {dimensions = array<i32: 0>} : vector<16x64xi32>
    %c2_i32 = arith.constant 2 : i32
    %2 = vector.broadcast %c2_i32 : i32 to vector<16x64xi32>
    %3 = arith.muli %1, %2 : vector<16x64xi32>
    %c0_i32 = arith.constant 0 : i32
    %4 = vector.broadcast %c0_i32 : i32 to vector<16x64xi32>
    %5 = arith.addi %3, %4 : vector<16x64xi32>
    %6 = arith.cmpi sge, %0, %5 : vector<16x64xi32>
    %c0_i32_0 = arith.constant 0 : i32
    %7 = vector.broadcast %c0_i32_0 : i32 to vector<16x64xi32>
    %8 = arith.addi %3, %7 : vector<16x64xi32>
    %c2_i32_1 = arith.constant 2 : i32
    %9 = vector.broadcast %c2_i32_1 : i32 to vector<16x64xi32>
    %10 = arith.addi %8, %9 : vector<16x64xi32>
    %11 = arith.cmpi slt, %0, %10 : vector<16x64xi32>
    %12 = arith.andi %6, %11 : vector<16x64xi1>
    %c32_i32 = arith.constant 32 : i32
    %13 = vector.broadcast %c32_i32 : i32 to vector<16x64xi32>
    %14 = arith.addi %3, %13 : vector<16x64xi32>
    %15 = arith.cmpi sge, %0, %14 : vector<16x64xi32>
    %c32_i32_2 = arith.constant 32 : i32
    %16 = vector.broadcast %c32_i32_2 : i32 to vector<16x64xi32>
    %17 = arith.addi %3, %16 : vector<16x64xi32>
    %c2_i32_3 = arith.constant 2 : i32
    %18 = vector.broadcast %c2_i32_3 : i32 to vector<16x64xi32>
    %19 = arith.addi %17, %18 : vector<16x64xi32>
    %20 = arith.cmpi slt, %0, %19 : vector<16x64xi32>
    %21 = arith.andi %15, %20 : vector<16x64xi1>
    %22 = arith.ori %12, %21 : vector<16x64xi1>
    %cst = arith.constant 1.000000e+00 : f32
    %cst_4 = arith.constant 0.000000e+00 : f32
    %23 = vector.broadcast %cst : f32 to vector<16x64xf32>
    %24 = vector.broadcast %cst_4 : f32 to vector<16x64xf32>
    %25 = arith.select %22, %23, %24 : vector<16x64xi1>, vector<16x64xf32>
    %c0 = arith.constant 0 : index
    %c0_5 = arith.constant 0 : index
    %26 = vector.load %arg1[%c0, %c0_5] : memref<32x16xf32, #tpu.memory_space<vmem>>, vector<32x16xf32>
    %cst_6 = arith.constant dense<0.000000e+00> : vector<32x64xf32>
    %27 = tpu.matmul %26, %25, %cst_6 {dimension_numbers = #tpu.dot_dimension_numbers<[1], [0], [0], [1], [0, 0, 1, 1], [], []>} : vector<32x16xf32>, vector<16x64xf32>, vector<32x64xf32> -> vector<32x64xf32>
    %c0_7 = arith.constant 0 : index
    %c0_8 = arith.constant 0 : index
    %28 = vector.load %arg2[%c0_7, %c0_8] : memref<32x64xf32, #tpu.memory_space<vmem>>, vector<32x64xf32>
    tpu.vector_store %arg2[%c0_7, %c0_8], %27 {strides = array<i32>} : memref<32x64xf32, #tpu.memory_space<vmem>>, vector<32x64xf32>,
    return
  }
  func.func @transform_0(%arg0: i32) -> (i32, i32) {
    %c0_i32 = arith.constant 0 : i32
    %c0_i32_0 = arith.constant 0 : i32
    return %arg0, %c0_i32 : i32, i32
  }
  func.func @transform_1(%arg0: i32) -> (i32, i32) {
    %c0_i32 = arith.constant 0 : i32
    %c0_i32_0 = arith.constant 0 : i32
    return %arg0, %c0_i32 : i32, i32
  }
}

</mosaic_0001>

<bundles_post_ra>
// kernel: tpu_custom_call.1
= control target key start
LH: loop header
LB: loop body
LE: loop exit
PB: predicated region body
PF: predicated region fallthrough
CT: control target
= control target key end

     0   :  { %v9_v0 = vlaneseq  ;;  %s178_s0 = inlined_call_operand.vmem [shape: f32[32,16], index: 0, kind: input, shape index: {}]   ;;  %s179_s1 = inlined_call_operand.hbm [shape: f32[32,64], index: 1, kind: output, shape index: {}]  }
   0x1   :  { %6 = vsyncpa [#allocation3], 0  ;;  %v149_v12 = vmov 1.0   ;;  %v40_v13 = vld [vmem:[%s178_s0 + $0x10] sm:$0xff]  ;;  %vm42_vm14 = vcmask 130048   ;;  %v41_v14 = vld [vmem:[%s178_s0 + $0x18] sm:$0xff] }
   0x2   :  { %v12_v1 = vshrl.u32 %v9_v0, 7  ;;  %v10_v2 = vand.u32 127, %v9_v0  ;;  %v38_v15 = vld [vmem:[%s178_s0] sm:$0xff]  ;;  %v39_v16 = vld [vmem:[%s178_s0 + $0x8] sm:$0xff]  ;;  %vm84_vm15 = vcmask 523264   ;;  %s150_s14 = smov [#allocation2]  }
   0x3   :  { %s93_s15 = sshll.u32 %s150_s14, 4  ;;  %s95_s18 = sshll.u32 %s179_s1, 4  ;;  %s94_s15 = int_to_ptr.vmem [resolvable:$true] %s93_s15  ;;  %s96_s18 = int_to_ptr.hbm [resolvable:$true] %s95_s18 }
   0x4   :  { %v13_v3 = vadd.s32 8, %v12_v1  ;;  %v14_v4 = vmul.u32 2, %v12_v1  ;;  %s151_s0 = smov 128   ;;  %s152_s19 = smov 8  }
   0x6   :  { %v15_v5 = vmul.u32 2, %v13_v3  ;;  %v18_v6 = vadd.s32 2, %v14_v4  ;;  %v24_v7 = vadd.s32 32, %v14_v4  ;;  %vm16_vm0 = vcmp.ge.s32.totalorder %v10_v2, %v14_v4 }
   0x8   :  { %vm17_vm1 = vcmp.ge.s32.totalorder %v10_v2, %v15_v5  ;;  %v19_v8 = vadd.s32 2, %v15_v5  ;;  %v25_v9 = vadd.s32 32, %v15_v5  ;;  %vm20_vm2 = vcmp.lt.s32.totalorder %v10_v2, %v18_v6 }
   0x9   :  { %vm26_vm3 = vcmp.ge.s32.totalorder %v10_v2, %v24_v7  ;;  %v28_v10 = vadd.s32 2, %v24_v7  ;;  %vm22_vm6 = vmand %vm16_vm0, %vm20_vm2 }
   0xa   :  { %vm21_vm4 = vcmp.lt.s32.totalorder %v10_v2, %v19_v8  ;;  %vm27_vm5 = vcmp.ge.s32.totalorder %v10_v2, %v25_v9  ;;  %v29_v11 = vadd.s32 2, %v25_v9 }
   0xb   :  { %vm23_vm7 = vmand %vm17_vm1, %vm21_vm4  ;;  %vm30_vm8 = vcmp.lt.s32.totalorder %v10_v2, %v28_v10 }
   0xc   :  { %vm31_vm9 = vcmp.lt.s32.totalorder %v10_v2, %v29_v11  ;;  %vm32_vm10 = vmand %vm26_vm3, %vm30_vm8 }
   0xd   :  { %vm33_vm11 = vmand %vm27_vm5, %vm31_vm9 }
   0xe   :  { %vm35_vm12 = vmor %vm23_vm7, %vm33_vm11 }
   0xf   :  { %114 = vmatpush.msk.msra.mxu2 %vm35_vm12, %v149_v12  ;;  %115 = vmatpush.msk.msra.mxu3 %vm35_vm12, %v149_v12  ;;  %vm34_vm13 = vmor %vm22_vm6, %vm32_vm10 }
  0x10   :  { %107 = vmatpush.msk.msra.mxu0 %vm35_vm12, %v149_v12  ;;  %113 = vmatpush.msk.msra.mxu1 %vm35_vm12, %v149_v12 }
  0x11   :  { %117 = vmatpush.msk.msra.mxu2 %vm34_vm13, %v149_v12  ;;  %118 = vmatpush.msk.msra.mxu3 %vm34_vm13, %v149_v12 }
  0x12   :  { %111 = vmatmul.msk.f32.vlgmr.msra.gmra.mxu2 %vm42_vm14, %v40_v13  ;;  %112 = vmatmul.msk.f32.vlgmr.msra.gmra.mxu3 %vm42_vm14, %v41_v14 }
  0x13   :  { %108 = vmatpush.msk.msra.mxu0 %vm34_vm13, %v149_v12  ;;  %116 = vmatpush.msk.msra.mxu1 %vm34_vm13, %v149_v12 }
  0x14   :  { %109 = vmatmul.msk.f32.vlgmr.msra.gmra.mxu0 %vm42_vm14, %v38_v15  ;;  %110 = vmatmul.msk.f32.vlgmr.msra.gmra.mxu1 %vm42_vm14, %v39_v16 }
  0x91   :  { %v72_v17 = vpop.f32.mrf.mxu0  ;;  %v75_v18 = vpop.f32.mrf.mxu1 }
  0x92   :  { %85 = vst.msk [vmem:[#allocation2] sm:$0xff] %vm84_vm15, %v72_v17 }
  0x93   :  { %86 = vst.msk [vmem:[#allocation2 + $0x8] sm:$0xff] %vm84_vm15, %v75_v18 }
  0x95   :  { %v78_v19 = vpop.f32.mrf.mxu2  ;;  %v81_v20 = vpop.f32.mrf.mxu3 }
  0x96   :  { %87 = vst.msk [vmem:[#allocation2 + $0x10] sm:$0xff] %vm84_vm15, %v78_v19 }
  0x97   :  { %88 = vst.msk [vmem:[#allocation2 + $0x18] sm:$0xff] %vm84_vm15, %v81_v20 }
  0x98   :  { %101 = dma.vmem_to_hbm [thread:$0]  %s94_s15, 512, %s96_s18, [#allocation3], %s151_s0, %s151_s0, %s152_s19  }
  0x99   :  { %147 = dma.done.wait [#allocation3], 512  }
  0x9a   :  { %148 = vsyncadd [#allocation3], 4294966784 }
  0x9b   :  { %106 = vsyncpa [#allocation3], 1 }

</bundles_post_ra>
